<compile_context>
chip_gen: v7x
topology: tpu7x:2x2x1
jax: 0.10.0
libtpu: 0.0.40
codegen_flags: <defaults>
</compile_context>

<pallas_src>
import functools

import numpy as np
import jax
import jax.numpy as jnp
from jax.experimental import pallas as pl
from jax.experimental.pallas import tpu as pltpu


# ----------------------------- config ---------------------------------------
class Config:
    sample_rate = 16000
    n_fft = 256
    win_length = 256
    hop_length = 64
    f_min = 0.0
    f_max = 8000.0
    n_mels = 80
    power = 1.0  # magnitude spectrogram (self.mel_spectrogram.spectrogram.power)


def _round_up(x, m):
    return ((x + m - 1) // m) * m


# ----------------------- deterministic parameter setup ----------------------
def _hz_to_mel(f):
    # Slaney mel scale (librosa default, htk=False)
    f = np.asarray(f, dtype=np.float64)
    f_sp = 200.0 / 3
    mels = f / f_sp
    min_log_hz = 1000.0
    min_log_mel = min_log_hz / f_sp
    logstep = np.log(6.4) / 27.0
    return np.where(f >= min_log_hz,
                    min_log_mel + np.log(np.maximum(f, 1e-10) / min_log_hz) / logstep,
                    mels)


def _mel_to_hz(m):
    m = np.asarray(m, dtype=np.float64)
    f_sp = 200.0 / 3
    freqs = f_sp * m
    min_log_hz = 1000.0
    min_log_mel = min_log_hz / f_sp
    logstep = np.log(6.4) / 27.0
    return np.where(m >= min_log_mel,
                    min_log_hz * np.exp(logstep * (m - min_log_mel)),
                    freqs)


def make_mel_basis(sr, n_fft, n_mels, fmin, fmax):
    """Reimplementation of librosa.filters.mel (htk=False, norm='slaney'). [n_mels, n_freq]."""
    n_freq = n_fft // 2 + 1
    fftfreqs = np.linspace(0.0, sr / 2.0, n_freq)
    mel_pts = np.linspace(_hz_to_mel(fmin), _hz_to_mel(fmax), n_mels + 2)
    mel_f = _mel_to_hz(mel_pts)
    fdiff = np.diff(mel_f)
    ramps = mel_f[:, None] - fftfreqs[None, :]
    weights = np.zeros((n_mels, n_freq), dtype=np.float64)
    for i in range(n_mels):
        lower = -ramps[i] / fdiff[i]
        upper = ramps[i + 2] / fdiff[i + 1]
        weights[i] = np.maximum(0.0, np.minimum(lower, upper))
    enorm = 2.0 / (mel_f[2:n_mels + 2] - mel_f[:n_mels])  # slaney normalization
    weights *= enorm[:, None]
    return weights.astype(np.float32)


def make_dft_mats(n_fft, win_length):
    """Window-folded real-DFT matrices: cosw, sinw of shape [n_fft, n_fft//2+1]."""
    n_freq = n_fft // 2 + 1
    # periodic Hann window (torch.hann_window default), zero-padded (centered) to n_fft
    n = np.arange(win_length, dtype=np.float64)
    hann = 0.5 * (1.0 - np.cos(2.0 * np.pi * n / win_length))
    window = np.zeros(n_fft, dtype=np.float64)
    off = (n_fft - win_length) // 2
    window[off:off + win_length] = hann
    nn = np.arange(n_fft, dtype=np.float64)[:, None]
    kk = np.arange(n_freq, dtype=np.float64)[None, :]
    ang = 2.0 * np.pi * nn * kk / n_fft
    cosw = (window[:, None] * np.cos(ang)).astype(np.float32)
    sinw = (window[:, None] * np.sin(ang)).astype(np.float32)
    return cosw, sinw


def _build_kernel_weights(cfg):
    """Fused, lane-dense DFT + mel weights.

    Returns (W [n_fft, 2*nfp], fb [nfp, n_mels_p], nfp, n_mels_p)."""
    n_fft = cfg.n_fft
    n_freq = n_fft // 2 + 1
    cosw, sinw = make_dft_mats(n_fft, cfg.win_length)                       # [n_fft, n_freq]
    fb = make_mel_basis(cfg.sample_rate, n_fft, cfg.n_mels, cfg.f_min, cfg.f_max)  # [n_mels, n_freq]

    # Drop trailing freq bins (Nyquist) whose mel weights are (numerically) zero —
    # exact when f_max == sr/2 — so the frequency axis becomes a multiple of 128 lanes.
    n_keep = n_freq
    if n_freq > 128 and np.max(np.abs(fb[:, 128:])) <= 1e-10 * max(float(np.max(np.abs(fb))), 1e-30):
        n_keep = 128
    nfp = _round_up(n_keep, 128)
    n_mels_p = _round_up(cfg.n_mels, 128)

    def pad_cols(a):
        return np.pad(a[:, :n_keep], ((0, 0), (0, nfp - n_keep)))

    # NOTE: kept in f32 (not bf16) — the DFT has heavy cancellation, so bf16 inputs
    # would exceed the 3e-4 log-mel tolerance (see review correctness concern).
    w = np.concatenate([pad_cols(cosw), pad_cols(sinw)], axis=1).astype(np.float32)  # [n_fft, 2*nfp]
    fb_p = np.zeros((nfp, n_mels_p), dtype=np.float32)
    fb_p[:n_keep, :cfg.n_mels] = fb[:, :n_keep].T
    return jnp.asarray(w), jnp.asarray(fb_p), nfp, n_mels_p


# ----------------------------- Pallas kernel ---------------------------------
def _mel_kernel(tf, hop, n_sub, nfp, power,
                main_ref, halo_ref, w_ref, fb_ref, out_ref, f_ref):
    # im2col: assemble the frame tile [tf, n_fft] directly from the main/halo chunk
    # blocks (no intermediate window-staging copy).  Frame r = chunk rows r..r+n_sub-1,
    # so chunk-slab s of every frame lands in columns [s*hop, (s+1)*hop).
    for s in range(n_sub):
        f_ref[0:tf - s, s * hop:(s + 1) * hop] = main_ref[0, s:tf, :]
        if s:
            f_ref[tf - s:tf, s * hop:(s + 1) * hop] = halo_ref[0, 0:s, :]

    # Single full-depth (K = n_fft = 256) windowed real-DFT matmul with the fused
    # [cos | sin] weights; f32 accumulation inside the MXU (no serial partial adds).
    acc = jnp.dot(f_ref[...], w_ref[...], preferred_element_type=jnp.float32)  # [tf, 2*nfp]

    re = acc[:, :nfp]                      # lane-aligned split of the fused output
    im = acc[:, nfp:]
    psd = re * re + im * im
    if power == 2.0:
        spec = psd
    elif power == 1.0:
        spec = jnp.sqrt(psd)
    else:
        spec = jnp.power(psd, power * 0.5)

    mel = jnp.dot(spec, fb_ref[...], preferred_element_type=jnp.float32)   # [tf, n_mels_p]
    out_ref[0] = jnp.log(jnp.maximum(mel, 1e-5))


# ------------------------------- wrapper --------------------------------------
def mel_spectrogram(audio, cfg=Config):
    """audio: [B, T] float32  ->  log-mel [B, n_mels, T'] float32."""
    n_fft, hop = cfg.n_fft, cfg.hop_length
    assert n_fft % hop == 0, "kernel assumes hop divides n_fft"
    n_sub = n_fft // hop
    n_mels = cfg.n_mels

    w, fb_p, nfp, n_mels_p = _build_kernel_weights(cfg)

    # reflect pad (matches the module's explicit F.pad with (n_fft - hop)//2, center=False)
    pad = (n_fft - hop) // 2
    x = jnp.pad(audio.astype(jnp.float32), ((0, 0), (pad, pad)), mode="reflect")
    B, t_padded = x.shape
    n_frames = 1 + (t_padded - n_fft) // hop

    # Tiling over frame rows.  Cap raised to 2048 (per-step VMEM ~12 MiB — large
    # headroom everywhere, incl. v7x).  halo = chunk-rows of lookahead per tile.
    TF_CAP = 2048
    tf = min(_round_up(n_frames, 8), TF_CAP)
    n_tiles = -(-n_frames // tf)
    # v7x has 2 TensorCores: make sure the (B, n_tiles) grid has >= 2 points when the
    # work allows it (small batch, long audio), so both cores are busy.
    if B * n_tiles < 2 and n_frames > 8:
        tf = _round_up(-(-n_frames // 2), 8)
        n_tiles = -(-n_frames // tf)

    halo = 8                               # >= n_sub - 1, sublane aligned
    n_frames_p = n_tiles * tf
    n_chunks = n_frames_p + halo

    # Hop-sized chunk view of the padded audio (plain reshape, ~1x audio HBM bytes).
    x = jnp.pad(x, ((0, 0), (0, n_chunks * hop - t_padded)))
    chunks = x.reshape(B, n_chunks, hop)

    kernel = functools.partial(_mel_kernel, tf, hop, n_sub, nfp, float(cfg.power))

    out = pl.pallas_call(
        kernel,
        out_shape=jax.ShapeDtypeStruct((B, n_frames_p, n_mels_p), jnp.float32),
        grid=(B, n_tiles),
        in_specs=[
            pl.BlockSpec((1, tf, hop), lambda b, i: (b, i, 0)),                        # main chunks
            pl.BlockSpec((1, halo, hop), lambda b, i: (b, (i + 1) * (tf // halo), 0)),  # halo chunks
            pl.BlockSpec((n_fft, 2 * nfp), lambda b, i: (0, 0)),                       # fused [cos|sin]
            pl.BlockSpec((nfp, n_mels_p), lambda b, i: (0, 0)),                        # mel filterbank
        ],
        out_specs=pl.BlockSpec((1, tf, n_mels_p), lambda b, i: (b, i, 0)),             # lane-dense (128)
        scratch_shapes=[pltpu.VMEM((tf, n_fft), jnp.float32)],                         # frame tile (im2col)
        compiler_params=pltpu.CompilerParams(
            dimension_semantics=("parallel", "parallel")),
    )(chunks, chunks, w, fb_p)

    mel = out[:, :n_frames, :n_mels]                     # drop frame/mel padding
    return jnp.transpose(mel, (0, 2, 1))                 # [B, n_mels, T']


# ----------------------------- reference (pure JAX) ---------------------------
def mel_spectrogram_ref(audio, cfg=Config):
    n_fft, hop, win = cfg.n_fft, cfg.hop_length, cfg.win_length
    pad = (n_fft - hop) // 2
    x = jnp.pad(audio.astype(jnp.float32), ((0, 0), (pad, pad)), mode="reflect")
    B, t_padded = x.shape
    n_frames = 1 + (t_padded - n_fft) // hop
    idx = jnp.arange(n_frames)[:, None] * hop + jnp.arange(n_fft)[None, :]
    frames = x[:, idx]                                              # [B, F, n_fft]
    cosw, sinw = make_dft_mats(n_fft, win)
    re = frames @ cosw
    im = frames @ sinw
    spec = jnp.power(re * re + im * im, cfg.power / 2.0)            # [B, F, n_freq]
    fb = jnp.asarray(make_mel_basis(cfg.sample_rate, n_fft, cfg.n_mels,
                                    cfg.f_min, cfg.f_max).T)
    mel = spec @ fb                                                 # [B, F, n_mels]
    return jnp.transpose(jnp.log(jnp.maximum(mel, 1e-5)), (0, 2, 1))


# ---------------------------------- main -------------------------------------
if __name__ == "__main__":
    key = jax.random.PRNGKey(0)
    B, T = 2, 1024                                                  # small [B, T] waveform
    audio = jax.random.normal(key, (B, T), dtype=jnp.float32)

    out = jax.block_until_ready(mel_spectrogram(audio))
    ref = jax.block_until_ready(mel_spectrogram_ref(audio))

    assert out.shape == (B, Config.n_mels, T // Config.hop_length), out.shape
    np.testing.assert_allclose(np.asarray(out), np.asarray(ref), rtol=3e-4, atol=3e-4)

    print("KERNEL_OK")
</pallas_src>

<mosaic_0001>
module attributes {stable_mosaic.version = 11 : i64} {
  func.func @_mel_kernel(%arg0: i32, %arg1: i32, %arg2: memref<1x16x64xf32, #tpu.memory_space<vmem>>, %arg3: memref<1x8x64xf32, #tpu.memory_space<vmem>>, %arg4: memref<256x256xf32, #tpu.memory_space<vmem>>, %arg5: memref<128x128xf32, #tpu.memory_space<vmem>>, %arg6: memref<1x16x128xf32, #tpu.memory_space<vmem>>, %arg7: memref<16x256xf32, #tpu.memory_space<vmem>>) attributes {dimension_semantics = [#tpu.dimension_semantics<parallel>, #tpu.dimension_semantics<parallel>], iteration_bounds = array<i64: 2, 1>, scalar_prefetch = 0 : i64, scratch_operands = 1 : i64, tpu.core_type = #tpu.core_type<tc>, window_params = [{transform_indices = @transform_0, window_bounds = array<i64: 1, 16, 64>}, {transform_indices = @transform_1, window_bounds = array<i64: 1, 8, 64>}, {pipeline_mode = #tpu.pipeline_mode<synchronous>, transform_indices = @transform_2, window_bounds = array<i64: 256, 256>}, {pipeline_mode = #tpu.pipeline_mode<synchronous>, transform_indices = @transform_3, window_bounds = array<i64: 128, 128>}, {transform_indices = @transform_4, window_bounds = array<i64: 1, 16, 128>}]} {
    %c0 = arith.constant 0 : index
    %c0_0 = arith.constant 0 : index
    %c0_1 = arith.constant 0 : index
    %0 = vector.load %arg2[%c0, %c0_0, %c0_1] : memref<1x16x64xf32, #tpu.memory_space<vmem>>, vector<1x16x64xf32>
    %1 = vector.shape_cast %0 : vector<1x16x64xf32> to vector<16x64xf32>
    %c0_2 = arith.constant 0 : index
    %c0_3 = arith.constant 0 : index
    %2 = vector.load %arg7[%c0_2, %c0_3] : memref<16x256xf32, #tpu.memory_space<vmem>>, vector<16x64xf32>
    tpu.vector_store %arg7[%c0_2, %c0_3], %1 {strides = array<i32>} : memref<16x256xf32, #tpu.memory_space<vmem>>, vector<16x64xf32>,
    %c0_4 = arith.constant 0 : index
    %c1 = arith.constant 1 : index
    %c0_5 = arith.constant 0 : index
    %3 = vector.load %arg2[%c0_4, %c1, %c0_5] : memref<1x16x64xf32, #tpu.memory_space<vmem>>, vector<1x15x64xf32>
    %4 = vector.shape_cast %3 : vector<1x15x64xf32> to vector<15x64xf32>
    %c0_6 = arith.constant 0 : index
    %c64 = arith.constant 64 : index
    %5 = vector.load %arg7[%c0_6, %c64] : memref<16x256xf32, #tpu.memory_space<vmem>>, vector<15x64xf32>
    tpu.vector_store %arg7[%c0_6, %c64], %4 {strides = array<i32>} : memref<16x256xf32, #tpu.memory_space<vmem>>, vector<15x64xf32>,
    %c0_7 = arith.constant 0 : index
    %c0_8 = arith.constant 0 : index
    %c0_9 = arith.constant 0 : index
    %6 = vector.load %arg3[%c0_7, %c0_8, %c0_9] : memref<1x8x64xf32, #tpu.memory_space<vmem>>, vector<1x1x64xf32>
    %7 = vector.shape_cast %6 : vector<1x1x64xf32> to vector<1x64xf32>
    %c15 = arith.constant 15 : index
    %c64_10 = arith.constant 64 : index
    %8 = vector.load %arg7[%c15, %c64_10] : memref<16x256xf32, #tpu.memory_space<vmem>>, vector<1x64xf32>
    tpu.vector_store %arg7[%c15, %c64_10], %7 {strides = array<i32>} : memref<16x256xf32, #tpu.memory_space<vmem>>, vector<1x64xf32>,
    %c0_11 = arith.constant 0 : index
    %c2 = arith.constant 2 : index
    %c0_12 = arith.constant 0 : index
    %9 = vector.load %arg2[%c0_11, %c2, %c0_12] : memref<1x16x64xf32, #tpu.memory_space<vmem>>, vector<1x14x64xf32>
    %10 = vector.shape_cast %9 : vector<1x14x64xf32> to vector<14x64xf32>
    %c0_13 = arith.constant 0 : index
    %c128 = arith.constant 128 : index
    %11 = vector.load %arg7[%c0_13, %c128] : memref<16x256xf32, #tpu.memory_space<vmem>>, vector<14x64xf32>
    tpu.vector_store %arg7[%c0_13, %c128], %10 {strides = array<i32>} : memref<16x256xf32, #tpu.memory_space<vmem>>, vector<14x64xf32>,
    %c0_14 = arith.constant 0 : index
    %c0_15 = arith.constant 0 : index
    %c0_16 = arith.constant 0 : index
    %12 = vector.load %arg3[%c0_14, %c0_15, %c0_16] : memref<1x8x64xf32, #tpu.memory_space<vmem>>, vector<1x2x64xf32>
    %13 = vector.shape_cast %12 : vector<1x2x64xf32> to vector<2x64xf32>
    %c14 = arith.constant 14 : index
    %c128_17 = arith.constant 128 : index
    %14 = vector.load %arg7[%c14, %c128_17] : memref<16x256xf32, #tpu.memory_space<vmem>>, vector<2x64xf32>
    tpu.vector_store %arg7[%c14, %c128_17], %13 {strides = array<i32>} : memref<16x256xf32, #tpu.memory_space<vmem>>, vector<2x64xf32>,
    %c0_18 = arith.constant 0 : index
    %c3 = arith.constant 3 : index
    %c0_19 = arith.constant 0 : index
    %15 = vector.load %arg2[%c0_18, %c3, %c0_19] : memref<1x16x64xf32, #tpu.memory_space<vmem>>, vector<1x13x64xf32>
    %16 = vector.shape_cast %15 : vector<1x13x64xf32> to vector<13x64xf32>
    %c0_20 = arith.constant 0 : index
    %c192 = arith.constant 192 : index
    %17 = vector.load %arg7[%c0_20, %c192] : memref<16x256xf32, #tpu.memory_space<vmem>>, vector<13x64xf32>
    tpu.vector_store %arg7[%c0_20, %c192], %16 {strides = array<i32>} : memref<16x256xf32, #tpu.memory_space<vmem>>, vector<13x64xf32>,
    %c0_21 = arith.constant 0 : index
    %c0_22 = arith.constant 0 : index
    %c0_23 = arith.constant 0 : index
    %18 = vector.load %arg3[%c0_21, %c0_22, %c0_23] : memref<1x8x64xf32, #tpu.memory_space<vmem>>, vector<1x3x64xf32>
    %19 = vector.shape_cast %18 : vector<1x3x64xf32> to vector<3x64xf32>
    %c13 = arith.constant 13 : index
    %c192_24 = arith.constant 192 : index
    %20 = vector.load %arg7[%c13, %c192_24] : memref<16x256xf32, #tpu.memory_space<vmem>>, vector<3x64xf32>
    tpu.vector_store %arg7[%c13, %c192_24], %19 {strides = array<i32>} : memref<16x256xf32, #tpu.memory_space<vmem>>, vector<3x64xf32>,
    %c0_25 = arith.constant 0 : index
    %c0_26 = arith.constant 0 : index
    %21 = vector.load %arg7[%c0_25, %c0_26] : memref<16x256xf32, #tpu.memory_space<vmem>>, vector<16x256xf32>
    %c0_27 = arith.constant 0 : index
    %c0_28 = arith.constant 0 : index
    %22 = vector.load %arg4[%c0_27, %c0_28] : memref<256x256xf32, #tpu.memory_space<vmem>>, vector<256x256xf32>
    %cst = arith.constant dense<0.000000e+00> : vector<16x256xf32>
    %23 = tpu.matmul %21, %22, %cst {dimension_numbers = #tpu.dot_dimension_numbers<[1], [0], [0], [1], [0, 0, 1, 1], [], []>} : vector<16x256xf32>, vector<256x256xf32>, vector<16x256xf32> -> vector<16x256xf32>
    %24 = vector.extract_strided_slice %23 {offsets = [0, 0], sizes = [16, 128], strides = [1, 1]} : vector<16x256xf32> to vector<16x128xf32>
    %25 = vector.extract_strided_slice %23 {offsets = [0, 128], sizes = [16, 128], strides = [1, 1]} : vector<16x256xf32> to vector<16x128xf32>
    %26 = arith.mulf %24, %24 : vector<16x128xf32>
    %27 = arith.mulf %25, %25 : vector<16x128xf32>
    %28 = arith.addf %26, %27 : vector<16x128xf32>
    %29 = math.sqrt %28 : vector<16x128xf32>
    %c0_29 = arith.constant 0 : index
    %c0_30 = arith.constant 0 : index
    %30 = vector.load %arg5[%c0_29, %c0_30] : memref<128x128xf32, #tpu.memory_space<vmem>>, vector<128x128xf32>
    %cst_31 = arith.constant dense<0.000000e+00> : vector<16x128xf32>
    %31 = tpu.matmul %29, %30, %cst_31 {dimension_numbers = #tpu.dot_dimension_numbers<[1], [0], [0], [1], [0, 0, 1, 1], [], []>} : vector<16x128xf32>, vector<128x128xf32>, vector<16x128xf32> -> vector<16x128xf32>
    %cst_32 = arith.constant 9.99999974E-6 : f32
    %32 = vector.broadcast %cst_32 : f32 to vector<16x128xf32>
    %33 = arith.maximumf %31, %32 : vector<16x128xf32>
    %34 = math.log %33 : vector<16x128xf32>
    %c0_33 = arith.constant 0 : index
    %c0_34 = arith.constant 0 : index
    %c0_35 = arith.constant 0 : index
    %35 = vector.load %arg6[%c0_33, %c0_34, %c0_35] : memref<1x16x128xf32, #tpu.memory_space<vmem>>, vector<1x16x128xf32>
    %36 = vector.shape_cast %35 : vector<1x16x128xf32> to vector<16x128xf32>
    %37 = vector.shape_cast %34 : vector<16x128xf32> to vector<1x16x128xf32>
    tpu.vector_store %arg6[%c0_33, %c0_34, %c0_35], %37 {strides = array<i32>} : memref<1x16x128xf32, #tpu.memory_space<vmem>>, vector<1x16x128xf32>,
    return
  }
  func.func @transform_0(%arg0: i32, %arg1: i32) -> (i32, i32, i32) {
    %c0_i32 = arith.constant 0 : i32
    %c0_i32_0 = arith.constant 0 : i32
    return %arg0, %arg1, %c0_i32 : i32, i32, i32
  }
  func.func @transform_1(%arg0: i32, %arg1: i32) -> (i32, i32, i32) {
    %c1_i32 = arith.constant 1 : i32
    %0 = arith.addi %arg1, %c1_i32 : i32
    %c2_i32 = arith.constant 2 : i32
    %1 = arith.muli %0, %c2_i32 : i32
    %c0_i32 = arith.constant 0 : i32
    %c0_i32_0 = arith.constant 0 : i32
    return %arg0, %1, %c0_i32 : i32, i32, i32
  }
  func.func @transform_2(%arg0: i32, %arg1: i32) -> (i32, i32) {
    %c0_i32 = arith.constant 0 : i32
    %c0_i32_0 = arith.constant 0 : i32
    %c0_i32_1 = arith.constant 0 : i32
    return %c0_i32, %c0_i32_0 : i32, i32
  }
  func.func @transform_3(%arg0: i32, %arg1: i32) -> (i32, i32) {
    %c0_i32 = arith.constant 0 : i32
    %c0_i32_0 = arith.constant 0 : i32
    %c0_i32_1 = arith.constant 0 : i32
    return %c0_i32, %c0_i32_0 : i32, i32
  }
  func.func @transform_4(%arg0: i32, %arg1: i32) -> (i32, i32, i32) {
    %c0_i32 = arith.constant 0 : i32
    %c0_i32_0 = arith.constant 0 : i32
    return %arg0, %arg1, %c0_i32 : i32, i32, i32
  }
}

</mosaic_0001>

<bundles_post_ra>
// kernel: tpu_custom_call.1
= control target key start
LH: loop header
LB: loop body
LE: loop exit
PB: predicated region body
PF: predicated region fallthrough
CT: control target
= control target key end

     0   :  { %s1643_s0 = inlined_call_operand.hbm [shape: f32[2,24,64], index: 0, kind: input, shape index: {}]   ;;  %s1644_s1 = inlined_call_operand.hbm [shape: f32[2,24,64], index: 1, kind: input, shape index: {}]   ;;  %s1645_s2 = inlined_call_operand.hbm [shape: f32[256,256], index: 2, kind: input, shape index: {}]   ;;  %s1646_s3 = inlined_call_operand.hbm [shape: f32[128,128], index: 3, kind: input, shape index: {}]   ;;  %s1647_s4 = inlined_call_operand.hbm [shape: f32[2,16,128], index: 4, kind: output, shape index: {}]  }
   0x1   :  { %1655 = sst [smem:[#allocation19_spill]] %s1643_s0 }
   0x2   :  { %1656 = sst [smem:[#allocation20_spill]] %s1645_s2 }
   0x3   :  { %1657 = sst [smem:[#allocation21_spill]] %s1646_s3 }
   0x4   :  { %9 = vsyncpa [#allocation4], 0 }
   0x5   :  { %11 = vsyncpa [#allocation4 + $0x1], 0 }
   0x6   :  { %12 = vsyncpa [#allocation7], 0 }
   0x7   :  { %14 = vsyncpa [#allocation7 + $0x1], 0 }
   0x8   :  { %15 = vsyncpa [#allocation10], 0 }
   0x9   :  { %16 = vsyncpa [#allocation5], 0 }
   0xa   :  { %18 = vsyncpa [#allocation5 + $0x1], 0  ;;  %s1320_s15 = smov 0   ;;  %s1322_s16 = smov 0  }
   0xb   :  { %s1324_s17 = smov 0   ;;  %s1326_s18 = smov 0  }
   0xc   :  { %s1328_s19 = smov 0   ;;  %s1330_s20 = smov 0  }
   0xd LB: > { %s1351_s21 = sadd.s32 4294967295, %s1281_s20   ;;  %s796_s22 = sadd.s32 4294967294, %s1281_s20   ;;  %s1281_s20 = sphi %s1330_s20, %s24_s20   ;;  %s1277_s19 = sphi %s1328_s19, %s1688_s19   ;;  %s1273_s18 = sphi %s1326_s18, %s1687_s18   ;;  %s1269_s17 = sphi %s1324_s17, %s1686_s17   ;;  %s1265_s16 = sphi %s1322_s16, %s1685_s16   ;;  %s1261_s15 = sphi %s1320_s15, %s1684_s15  }
   0xe   : > { %p58_p0 = scmp.ne.s32.totalorder %s1265_s16, %s1261_s15  ;;  %p1648_p1 = scmp.eq.s32.totalorder %s1351_s21, 0 }
   0xf   : > { %p164_p3 = scmp.eq.s32.totalorder %s796_s22, 1  ;;  %p797_p5 = scmp.ge.s32.totalorder %s1281_s20, 1 }
  0x10   : > { %p1360_p4 = por %p1648_p1, %p58_p0  ;;  %p171_p7 = scmp.lt.s32.totalorder %s1281_s20, 3 }
  0x11   : > { %p1365_p6 = por %p164_p3, %p58_p0  ;;  %s1283_s26 = smov [#allocation8]  }
  0x12   : > { %s1658_s23 = scalar_select %p1360_p4, 1, 0 }
  0x13   : > { %s1659_s24 = scalar_select %p1365_p6, 1, 0 }
  0x14   : > { %p1370_p8 = pnand %p797_p5, %p171_p7  ;;  %s183_s27 = sshll.u32 %s1283_s26, 4  ;;  %s1374_s27 = int_to_ptr.vmem [resolvable:$true] %s183_s27 }
  0x15   : > { %s1284_s29 = smov [#allocation9]   ;;  %s1662_s2 = sld [smem:[#allocation20_spill]] }
  0x16   : > { %s1660_s25 = scalar_select %p1370_p8, 1, 0 }
  0x17   : > { %p981_p9 = pneg %p1370_p8  ;;  %s196_s30 = sshll.u32 %s1284_s29, 4  ;;  %s1385_s30 = int_to_ptr.vmem [resolvable:$true] %s196_s30 }
  0x19   : > { %p1381_p11 = pnand %p981_p9, %p1648_p1 }
  0x1b   : > { %s1070_s7 = scalar_lea.hbm %s1662_s2, 8192  ;;  %p1072_p13 = pneg %p1381_p11 }
  0x1c   : > { %p1071_p12 = scmp.ne.s32.totalorder %s1662_s2, %s1070_s7  ;;  %p1077_p5 = scmp.lt.u32.totalorder %s1070_s7, %s1662_s2 }
  0x1e   : > { %p1073_p0 = pnand %p1072_p13, %p1071_p12 }
  0x20   : > { %p1074_p3 = pneg %p1073_p0 }
  0x22   : > { %p1079_p7 = pnand %p1077_p5, %p1074_p3 }
  0x24   : > { %1082 = shalt.err (!%p1079_p7)
}
  0x25   : > { %s1083_s12 = scalar_lea.vmem %s1374_s27, 8192  ;;  %p1091_p2 = scmp.lt.s32.totalorder %s1374_s27, %s1374_s27 }
  0x26   : > { %p1084_p9 = scmp.ne.s32.totalorder %s1374_s27, %s1083_s12  ;;  %p1092_p12 = scmp.lt.s32.totalorder %s1083_s12, %s1083_s12 }
  0x28   : > { %p1086_p10 = pnand %p1084_p9, %p1072_p13  ;;  %p1093_p0 = por %p1092_p12, %p1091_p2 }
  0x2a   : > { %p1087_p1 = pneg %p1086_p10 }
  0x2c   : > { %p1094_p6 = pnand %p1093_p0, %p1087_p1 }
  0x2e   : > { %1097 = shalt.err (!%p1094_p6)
}
  0x2f   : > { %s1285_s13 = smov 256   ;;  %s1286_s14 = smov 16  }
  0x30   : > { %984 = dma.hbm_to_vmem [thread:$0]  (!%p1381_p11), %s1662_s2, 8192, %s1374_s27, [#allocation7], %s1285_s13, %s1285_s13, %s1286_s14  }
  0x31   : > { %s1663_s3 = sld [smem:[#allocation21_spill]] }
  0x37   : > { %s1098_s6 = scalar_lea.hbm %s1663_s3, 2048 }
  0x38   : > { %p1099_p2 = scmp.ne.s32.totalorder %s1663_s3, %s1098_s6  ;;  %p1105_p10 = scmp.lt.u32.totalorder %s1098_s6, %s1663_s3 }
  0x3a   : > { %p1101_p1 = pnand %p1099_p2, %p1072_p13 }
  0x3c   : > { %p1102_p6 = pneg %p1101_p1 }
  0x3e   : > { %p1107_p3 = pnand %p1105_p10, %p1102_p6 }
  0x40   : > { %1110 = shalt.err (!%p1107_p3)
}
  0x41   : > { %s1111_s27 = scalar_lea.vmem %s1385_s30, 2048  ;;  %p1119_p12 = scmp.lt.s32.totalorder %s1385_s30, %s1385_s30 }
  0x42   : > { %p1112_p5 = scmp.ne.s32.totalorder %s1385_s30, %s1111_s27  ;;  %p1120_p0 = scmp.lt.s32.totalorder %s1111_s27, %s1111_s27 }
  0x44   : > { %p1114_p7 = pnand %p1112_p5, %p1072_p13  ;;  %p1121_p2 = por %p1120_p0, %p1119_p12 }
  0x46   : > { %p1115_p9 = pneg %p1114_p7 }
  0x48   : > { %p1122_p1 = pnand %p1121_p2, %p1115_p9 }
  0x4a   : > { %1125 = shalt.err (!%p1122_p1)
}
  0x4b   : > { %s1650_s11 = smov 128   ;;  %s1288_s12 = smov 8  }
  0x4c   : > { %987 = dma.hbm_to_vmem [thread:$0]  (!%p1381_p11), %s1663_s3, 2048, %s1385_s30, [#allocation10], %s1650_s11, %s1650_s11, %s1288_s12  }
  0x4d   : > { %s36_s22 = sadd.s32 1, %s1277_s19  ;;  %s45_s26 = sadd.s32 1, %s1269_s17 }
  0x4e   : > { %p38_p13 = scmp.ge.s32.totalorder %s36_s22, 2  ;;  %p52_p6 = scmp.ne.s32.totalorder %s1269_s17, %s1265_s16 }
  0x4f   : > { %p53_p10 = scmp.eq.s32.totalorder %s1281_s20, 0  ;;  %p1001_p3 = scmp.lt.s32.totalorder %s1281_s20, 2 }
  0x50   : > { %s1690_s22 = smov (%p38_p13, %s36_s22), 0  ;;  %p1665_p7 = scmp.eq.s32.totalorder %s1351_s21, 1 }
  0x51   : > { %1664 = sst [smem:[#allocation17_spill]] %s1690_s22  ;;  %p54_p5 = por %p53_p10, %p52_p6 }
  0x52   : > { %p1452_p9 = por %p1665_p7, %p52_p6  ;;  %s40_s29 = ssub.s32 %s1277_s19, %s1690_s22 }
  0x53   : > { %s1459_s30 = sand.u32 1, %s1269_s17   ;;  %p43_p11 = scmp.eq.s32.totalorder %s40_s29, 0 }
  0x54   : > { %s1666_s28 = scalar_select %p1452_p9, 1, 0 }
  0x55   : > { %s801_s5 = sshll.u32 %s1459_s30, 4  ;;  %s1649_s6 = smul.u32 384, %s1277_s19 }
  0x56   : > { %s1464_s7 = scalar_select %p43_p11, %s1269_s17, %s45_s26  }
  0x57   : > { %s1668_s0 = sld [smem:[#allocation19_spill]]  ;;  %s214_s27 = scalar_lea.vmem [#allocation3], %s801_s5 }
  0x58   : > { %1667 = sst [smem:[#allocation18_spill]] %s1464_s7  ;;  %s229_s13 = sshll.u32 %s214_s27, 4  ;;  %s1479_s13 = int_to_ptr.vmem [resolvable:$true] %s229_s13 }
  0x59   : > { %p1475_p12 = pnand %p1001_p3, %p54_p5  ;;  %s211_s29 = scalar_lea.sflag [#allocation4], %s1459_s30 }
  0x5b   : > { %p1128_p2 = pneg %p1475_p12 }
  0x5d   : > { %s1471_s10 = scalar_lea.hbm %s1668_s0, %s1649_s6  ;;  %s1131_s27 = scalar_lea.hbm %s1668_s0, 768 }
  0x5e   : > { %s1126_s8 = scalar_lea.hbm %s1471_s10, 256  ;;  %p1132_p6 = scmp.lt.u32.totalorder %s1471_s10, %s1668_s0 }
  0x5f   : > { %p1127_p0 = scmp.ne.s32.totalorder %s1471_s10, %s1126_s8  ;;  %p1133_p10 = scmp.lt.u32.totalorder %s1131_s27, %s1126_s8 }
  0x60   : > { %p1135_p5 = scmp.lt.u32.totalorder %s1126_s8, %s1471_s10 }
  0x61   : > { %p1129_p1 = pnand %p1128_p2, %p1127_p0  ;;  %p1134_p3 = por %p1133_p10, %p1132_p6 }
  0x63   : > { %p1130_p13 = pneg %p1129_p1  ;;  %p1136_p7 = por %p1135_p5, %p1134_p3 }
  0x65   : > { %p1137_p11 = pnand %p1136_p7, %p1130_p13 }
  0x67   : > { %1140 = shalt.err (!%p1137_p11)
}
  0x68   : > { %s1141_s26 = scalar_lea.vmem %s1479_s13, 256  ;;  %s1289_s5 = smov [#allocation3]  }
  0x69   : > { %p1142_p0 = scmp.ne.s32.totalorder %s1479_s13, %s1141_s26  ;;  %s1146_s9 = sshll.u32 %s1289_s5, 4  ;;  %s1147_s9 = int_to_ptr.vmem [resolvable:$false] %s1146_s9 }
  0x6a   : > { %s1148_s11 = scalar_lea.vmem %s1147_s9, 512  ;;  %p1149_p4 = scmp.lt.s32.totalorder %s1479_s13, %s1147_s9 }
  0x6b   : > { %p1144_p1 = pnand %p1142_p0, %p1128_p2  ;;  %p1150_p6 = scmp.lt.s32.totalorder %s1148_s11, %s1141_s26 }
  0x6d   : > { %p1145_p9 = pneg %p1144_p1  ;;  %p1151_p10 = por %p1150_p6, %p1149_p4 }
  0x6f   : > { %p1152_p3 = pnand %p1151_p10, %p1145_p9 }
  0x71   : > { %1155 = shalt.err (!%p1152_p3)
}
  0x72   : > { %s1670_s6 = smov 128   ;;  %s803_s8 = sshll.u32 %s1459_s30, 3 }
  0x73   : > { %991 = dma.hbm_to_vmem [thread:$0]  (!%p1475_p12), %s1471_s10, 256, %s1479_s13, %s211_s29, %s1670_s6, %s1670_s6, %s1288_s12  }
  0x74   : > { %s1671_s27 = smul.u32 384, %s1277_s19  ;;  %s243_s0 = scalar_lea.vmem [#allocation6], %s803_s8 }
  0x75   : > { %s254_s2 = sshll.u32 %s243_s0, 4  ;;  %s1672_s3 = sand.u32 1, %s1281_s20   ;;  %s255_s2 = int_to_ptr.vmem [resolvable:$true] %s254_s2 }
  0x76   : > { %s708_s9 = scalar_lea.hbm %s1644_s1, %s1671_s27  ;;  %s240_s22 = scalar_lea.sflag [#allocation7], %s1672_s3 }
  0x77   : > { %s1519_s11 = scalar_lea.hbm %s708_s9, 256  ;;  %s1186_s7 = scalar_lea.hbm %s708_s9, 384 }
  0x78   : > { %p1157_p4 = scmp.ne.s32.totalorder %s1519_s11, %s1186_s7  ;;  %s1161_s10 = scalar_lea.hbm %s1644_s1, 768 }
  0x79   : > { %p1162_p5 = scmp.lt.u32.totalorder %s1519_s11, %s1644_s1  ;;  %p1163_p7 = scmp.lt.u32.totalorder %s1161_s10, %s1186_s7 }
  0x7a   : > { %p1159_p9 = pnand %p1157_p4, %p1128_p2  ;;  %p1165_p0 = scmp.lt.u32.totalorder %s1186_s7, %s1519_s11 }
  0x7b   : > { %p1164_p11 = por %p1163_p7, %p1162_p5 }
  0x7c   : > { %p1160_p13 = pneg %p1159_p9 }
  0x7d   : > { %p1166_p1 = por %p1165_p0, %p1164_p11 }
  0x7f   : > { %p1167_p6 = pnand %p1166_p1, %p1160_p13 }
  0x81   : > { %1170 = shalt.err (!%p1167_p6)
}
  0x82   : > { %s1171_s0 = scalar_lea.vmem %s255_s2, 128  ;;  %s1290_s3 = smov [#allocation6]  }
  0x83   : > { %p1172_p10 = scmp.ne.s32.totalorder %s255_s2, %s1171_s0  ;;  %s1176_s6 = sshll.u32 %s1290_s3, 4  ;;  %s1177_s6 = int_to_ptr.vmem [resolvable:$false] %s1176_s6 }
  0x84   : > { %s1178_s8 = scalar_lea.vmem %s1177_s6, 256  ;;  %p1179_p9 = scmp.lt.s32.totalorder %s255_s2, %s1177_s6 }
  0x85   : > { %p1174_p3 = pnand %p1172_p10, %p1128_p2  ;;  %p1180_p8 = scmp.lt.s32.totalorder %s1178_s8, %s1171_s0 }
  0x87   : > { %p1175_p4 = pneg %p1174_p3  ;;  %p1181_p5 = por %p1180_p8, %p1179_p9 }
  0x89   : > { %p1182_p7 = pnand %p1181_p5, %p1175_p4 }
  0x8b   : > { %1185 = shalt.err (!%p1182_p7)
}
  0x8c   : > { %994 = dma.hbm_to_vmem [thread:$0]  (!%p1475_p12), %s1519_s11, 128, %s255_s2, %s240_s22  }
  0x8d   : > { %p1673_p13 = scmp.ne.s32.totalorder %s1660_s25, 0 }
  0x8e   : > { %s1544_s7 = sand.u32 (!%p1673_p13), 1, %s1265_s16   ;;  %p1674_p8 = scmp.ne.s32.totalorder (!%p1673_p13), %s1658_s23, 0 }
  0x8f   : > { %263 = sbr.rel (%p1673_p13) target bundleno = 769 (0x301), region = 36  ;;  %s806_s27 = sshll.u32 (!%p1673_p13), %s1544_s7, 4 }
  0x90   : > { %s266_s26 = scalar_lea.sflag (!%p1673_p13), [#allocation4], %s1544_s7  ;;  %s1550_s5 = scalar_lea.vmem (!%p1673_p13), [#allocation3], %s806_s27 }
  0x96   : > { %1240 = dma.done.wait (%p1674_p8), %s266_s26, 256  }
  0x97   : > { %1242 = vsyncadd (%p1674_p8), %s266_s26, 4294967040  ;;  %s274_s2 = sand.u32 1, %s1351_s21   ;;  %s807_s25 = sshll.u32 %s1544_s7, 3 }
  0x98   : > { %s275_s22 = scalar_lea.sflag [#allocation7], %s274_s2  ;;  %s1558_s14 = scalar_lea.vmem [#allocation6], %s807_s25 }
  0x99   : > { %1244 = dma.done.wait (%p1674_p8), %s275_s22, 128  }
  0x9a   : > { %1246 = vsyncadd (%p1674_p8), %s275_s22, 4294967168  ;;  %p1675_p12 = scmp.eq.s32.totalorder %s1351_s21, 0 }
  0x9c   : > { %1248 = dma.done.wait (%p1675_p12), [#allocation7], 8192   ;;  %p1676_p2 = pmov %p1675_p12 }
  0x9e   : > { %1250 = vsyncadd (%p1676_p2), [#allocation7], 4294959104  ;;  %p1677_p11 = pmov %p1676_p2 }
  0x9f   : > { %p1678_p0 = pmov %p1676_p2 }
  0xa0   : > { %1252 = dma.done.wait (%p1677_p11), [#allocation10], 2048  }
  0xa1   : > { %1254 = vsyncadd (%p1678_p0), [#allocation10], 4294965248  ;;  %v362_v0 = vld [vmem:[%s1550_s5 + $0xb] sm:$0x1f]  ;;  %v361_v1 = vld [vmem:[%s1550_s5 + $0x3] sm:$0xff]  ;;  %s1291_s23 = smov 64  }
  0xa2   : > { %v374_v2 = vld [vmem:[%s1558_s14] sm:$0x7]  ;;  %367 = vrot.lane.b32.xlu1 %v362_v0, %s1291_s23  ;;  %365 = vrot.lane.b32.xlu0 %v361_v1, %s1291_s23  ;;  %v387_v4 = vld [vmem:[#allocation8 + $0x8] sm:$0xff]  ;;  %v386_v7 = vld [vmem:[#allocation8] sm:$0xff]  ;;  %vm353_vm0 = vcmask 521216   ;;  %vm326_vm1 = vcmask 523264  }
  0xa3   : > { %v376_v3 = vrot.slane %v374_v2, 3  ;;  %v329_v5 = vld [vmem:[%s1550_s5 + $0x1] sm:$0xff]  ;;  %v343_v18 = vld [vmem:[%s1558_s14] sm:$0x1]  ;;  %v330_v19 = vld [vmem:[%s1550_s5 + $0x9] sm:$0x7f] }
  0xa4   : > { %v389_v6 = vld [vmem:[#allocation8 + $0x18] sm:$0xff]  ;;  %v388_v9 = vld [vmem:[#allocation8 + $0x10] sm:$0xff]  ;;  %v391_v10 = vld [vmem:[#allocation8 + $0x28] sm:$0xff]  ;;  %vm359_vm2 = vcmask 523270   ;;  %vm372_vm3 = vcmask 1044992   ;;  %vm339_vm4 = vcmask 1048064  }
  0xa5   : > { %v870_v8 = vpack.c.bf16 %v389_v6, %v387_v4  ;;  %v393_v11 = vld [vmem:[#allocation8 + $0x38] sm:$0xff]  ;;  %v872_v12 = vpack.c.bf16 %v388_v9, %v386_v7  ;;  %v390_v14 = vld [vmem:[#allocation8 + $0x20] sm:$0xff]  ;;  %v392_v15 = vld [vmem:[#allocation8 + $0x30] sm:$0xff]  ;;  %vm380_vm5 = vcmask 1048069   ;;  %vm348_vm6 = vcmask 1040896   ;;  %s315_s21 = scalar_lea.vmem [#allocation11], %s806_s27 }
  0xa6   : > { %v874_v13 = vpack.c.bf16 %v393_v11, %v391_v10  ;;  %377 = vrot.lane.b32.xlu1 %v376_v3, %s1291_s23  ;;  %333 = vrot.lane.b32.xlu0 %v329_v5, %s1291_s23  ;;  %v395_v16 = vld [vmem:[#allocation8 + $0x48] sm:$0xff]  ;;  %v397_v17 = vld [vmem:[#allocation8 + $0x58] sm:$0xff]  ;;  %v876_v20 = vpack.c.bf16 %v392_v15, %v390_v14  ;;  %v394_v22 = vld [vmem:[#allocation8 + $0x40] sm:$0xff]  ;;  %vm341_vm7 = vcmask 1047040   ;;  %s662_s9 = sshll.u32 %s315_s21, 4  ;;  %s816_s11 = sshll.u32 %s1273_s18, 8  ;;  %s1589_s9 = int_to_ptr.vmem [resolvable:$true] %s662_s9 }
  0xa7   : > { %871 = vmatprep.subr.bf16.mxu0 %v870_v8  ;;  %v878_v21 = vpack.c.bf16 %v397_v17, %v395_v16  ;;  %v396_v23 = vld [vmem:[#allocation8 + $0x50] sm:$0xff]  ;;  %v399_v24 = vld [vmem:[#allocation8 + $0x68] sm:$0xff]  ;;  %v401_v25 = vld [vmem:[#allocation8 + $0x78] sm:$0xff]  ;;  %s1594_s10 = scalar_lea.hbm %s1647_s4, %s816_s11  ;;  %s647_s13 = scalar_lea.sflag [#allocation5], %s1544_s7 }
  0xa8   : > { %873 = vmatpush1.bf16.msra.mxu0 %v872_v12  ;;  %v880_v26 = vpack.c.bf16 %v396_v23, %v394_v22  ;;  %v882_v27 = vpack.c.bf16 %v401_v25, %v399_v24  ;;  %v398_v28 = vld [vmem:[#allocation8 + $0x60] sm:$0xff]  ;;  %v400_v29 = vld [vmem:[#allocation8 + $0x70] sm:$0xff]  ;;  %v403_v30 = vld [vmem:[#allocation8 + $0x88] sm:$0xff]  ;;  %s1187_s29 = scalar_lea.vmem %s1589_s9, 256  ;;  %p1679_p6 = scmp.ne.s32.totalorder %s1666_s28, 0 }
  0xa9   : > { %875 = vmatprep.subr.bf16.mxu0 %v874_v13  ;;  %v405_v31 = vld [vmem:[#allocation8 + $0x98] sm:$0xff]  ;;  %v884_v32 = vpack.c.bf16 %v400_v29, %v398_v28  ;;  %v402_v34 = vld [vmem:[#allocation8 + $0x80] sm:$0xff]  ;;  %v404_v35 = vld [vmem:[#allocation8 + $0x90] sm:$0xff]  ;;  %p1188_p1 = scmp.ne.s32.totalorder %s1589_s9, %s1187_s29  ;;  %s1292_s18 = smov [#allocation11]  }
  0xaa   : > { %345 = vrot.lane.b32.xlu1 %v343_v18, %s1291_s23  ;;  %335 = vrot.lane.b32.xlu0 %v330_v19, %s1291_s23  ;;  %v886_v33 = vpack.c.bf16 %v405_v31, %v403_v30  ;;  %v407_v36 = vld [vmem:[#allocation8 + $0xa8] sm:$0xff]  ;;  %v409_v37 = vld [vmem:[#allocation8 + $0xb8] sm:$0xff]  ;;  %v888_v38 = vpack.c.bf16 %v404_v35, %v402_v34  ;;  %v406_v42 = vld [vmem:[#allocation8 + $0xa0] sm:$0xff]  ;;  %s1191_s0 = sshll.u32 %s1292_s18, 4  ;;  %s1192_s0 = int_to_ptr.vmem [resolvable:$false] %s1191_s0 }
  0xab   : > { %v351_v39 = vld [vmem:[%s1550_s5 + $0xa] sm:$0x3f]  ;;  %v350_v40 = vld [vmem:[%s1550_s5 + $0x2] sm:$0xff]  ;;  %v890_v41 = vpack.c.bf16 %v409_v37, %v407_v36  ;;  %v355_v46 = vld [vmem:[%s1558_s14] sm:$0x3]  ;;  %p1189_p10 = pnand %p1188_p1, %p1679_p6  ;;  %s1193_s3 = scalar_lea.vmem %s1192_s0, 512 }
  0xac   : > { %877 = vmatpush1.bf16.msra.mxu0 %v876_v20  ;;  %v408_v43 = vld [vmem:[#allocation8 + $0xb0] sm:$0xff]  ;;  %v411_v44 = vld [vmem:[#allocation8 + $0xc8] sm:$0xff]  ;;  %354 = vst.msk [vmem:[#allocation2 + $0x18] sm:$0x3f] %vm353_vm0, %v351_v39  ;;  %v413_v45 = vld [vmem:[#allocation8 + $0xd8] sm:$0xff]  ;;  %v357_v48 = vrot.slane %v355_v46, 2  ;;  %p1194_p4 = scmp.lt.s32.totalorder %s1589_s9, %s1192_s0  ;;  %p1195_p9 = scmp.lt.s32.totalorder %s1193_s3, %s1187_s29 }
  0xad   : > { %879 = vmatprep.subr.bf16.mxu0 %v878_v21  ;;  %352 = vst.msk [vmem:[#allocation2 + $0x8] sm:$0xff] %vm326_vm1, %v350_v40  ;;  %v324_v47 = vld [vmem:[%s1550_s5] sm:$0xff]  ;;  %v892_v49 = vpack.c.bf16 %v408_v43, %v406_v42  ;;  %v325_v51 = vld [vmem:[%s1550_s5 + $0x8] sm:$0xff]  ;;  %v894_v52 = vpack.c.bf16 %v413_v45, %v411_v44  ;;  %p1190_p3 = pneg %p1189_p10 }
  0xae   : > { %327 = vst.msk [vmem:[#allocation2] sm:$0xff] %vm326_vm1, %v324_v47  ;;  %v410_v50 = vld [vmem:[#allocation8 + $0xc0] sm:$0xff]  ;;  %v412_v53 = vld [vmem:[#allocation8 + $0xd0] sm:$0xff]  ;;  %v415_v54 = vld [vmem:[#allocation8 + $0xe8] sm:$0xff]  ;;  %p1196_p5 = por %p1195_p9, %p1194_p4 }
  0xaf   : > { %v417_v55 = vld [vmem:[#allocation8 + $0xf8] sm:$0xff]  ;;  %360 = vst.msk [vmem:[#allocation2 + $0x18] sm:$0xc0] %vm359_vm2, %v357_v48  ;;  %v547_v56 = vld [vmem:[#allocation9] sm:$0xff]  ;;  %v548_v57 = vld [vmem:[#allocation9 + $0x8] sm:$0xff]  ;;  %v896_v61 = vpack.c.bf16 %v412_v53, %v410_v50 }
  0xb0   : > { %881 = vmatpush1.bf16.msra.mxu0 %v880_v26  ;;  %328 = vst.msk [vmem:[#allocation2 + $0x10] sm:$0xff] %vm326_vm1, %v325_v51  ;;  %v549_v58 = vld [vmem:[#allocation9 + $0x10] sm:$0xff]  ;;  %v934_v59 = vpack.c.bf16 %v548_v57, %v547_v56  ;;  %v550_v60 = vld [vmem:[#allocation9 + $0x18] sm:$0xff]  ;;  %v898_v63 = vpack.c.bf16 %v417_v55, %v415_v54  ;;  %v414_v0 = vld [vmem:[#allocation8 + $0xe0] sm:$0xff]  ;;  %p1197_p7 = pnand %p1196_p5, %p1190_p3 }
  0xb1   : > { %883 = vmatprep.subr.bf16.mxu0 %v882_v27  ;;  %v938_v62 = vpack.c.bf16 %v550_v60, %v549_v58  ;;  %v416_v1 = vld [vmem:[#allocation8 + $0xf0] sm:$0xff]  ;;  %v419_v2 = vld [vmem:[#allocation8 + $0x108] sm:$0xff]  ;;  %v421_v3 = vld [vmem:[#allocation8 + $0x118] sm:$0xff] }
  0xb2   : > { %935 = vmatprep.subr.bf16.mxu1 %v934_v59  ;;  %v900_v4 = vpack.c.bf16 %v416_v1, %v414_v0  ;;  %v902_v5 = vpack.c.bf16 %v421_v3, %v419_v2  ;;  %v418_v6 = vld [vmem:[#allocation8 + $0x100] sm:$0xff]  ;;  %v420_v7 = vld [vmem:[#allocation8 + $0x110] sm:$0xff]  ;;  %v423_v8 = vld [vmem:[#allocation8 + $0x128] sm:$0xff] }
  0xb3   : > { %937 = vmatpush3.bf16.msra.mxu1 %v934_v59  ;;  %v425_v9 = vld [vmem:[#allocation8 + $0x138] sm:$0xff]  ;;  %v904_v10 = vpack.c.bf16 %v420_v7, %v418_v6  ;;  %v422_v12 = vld [vmem:[#allocation8 + $0x120] sm:$0xff]  ;;  %v424_v13 = vld [vmem:[#allocation8 + $0x130] sm:$0xff] }
  0xb4   : > { %885 = vmatpush1.bf16.msra.mxu0 %v884_v32  ;;  %939 = vmatprep.subr.bf16.mxu1 %v938_v62  ;;  %v906_v11 = vpack.c.bf16 %v425_v9, %v423_v8  ;;  %v427_v14 = vld [vmem:[#allocation8 + $0x148] sm:$0xff]  ;;  %v429_v15 = vld [vmem:[#allocation8 + $0x158] sm:$0xff]  ;;  %v908_v16 = vpack.c.bf16 %v424_v13, %v422_v12  ;;  %v426_v18 = vld [vmem:[#allocation8 + $0x140] sm:$0xff] }
  0xb5   : > { %887 = vmatprep.subr.bf16.mxu0 %v886_v33  ;;  %v910_v17 = vpack.c.bf16 %v429_v15, %v427_v14  ;;  %v428_v19 = vld [vmem:[#allocation8 + $0x150] sm:$0xff]  ;;  %v431_v20 = vld [vmem:[#allocation8 + $0x168] sm:$0xff]  ;;  %v433_v21 = vld [vmem:[#allocation8 + $0x178] sm:$0xff] }
  0xb6   : > { %v912_v22 = vpack.c.bf16 %v428_v19, %v426_v18  ;;  %v914_v23 = vpack.c.bf16 %v433_v21, %v431_v20  ;;  %v430_v24 = vld [vmem:[#allocation8 + $0x160] sm:$0xff]  ;;  %v432_v25 = vld [vmem:[#allocation8 + $0x170] sm:$0xff]  ;;  %v435_v26 = vld [vmem:[#allocation8 + $0x188] sm:$0xff] }
  0xb7   : > { %941 = vmatpush3.bf16.msra.mxu1 %v938_v62  ;;  %v437_v27 = vld [vmem:[#allocation8 + $0x198] sm:$0xff]  ;;  %v916_v28 = vpack.c.bf16 %v432_v25, %v430_v24  ;;  %v434_v30 = vld [vmem:[#allocation8 + $0x180] sm:$0xff]  ;;  %v436_v31 = vld [vmem:[#allocation8 + $0x190] sm:$0xff] }
  0xb8   : > { %889 = vmatpush1.bf16.msra.mxu0 %v888_v38  ;;  %v918_v29 = vpack.c.bf16 %v437_v27, %v435_v26  ;;  %v439_v32 = vld [vmem:[#allocation8 + $0x1a8] sm:$0xff]  ;;  %v441_v33 = vld [vmem:[#allocation8 + $0x1b8] sm:$0xff]  ;;  %v920_v34 = vpack.c.bf16 %v436_v31, %v434_v30  ;;  %v438_v36 = vld [vmem:[#allocation8 + $0x1a0] sm:$0xff] }
  0xb9   : > { %891 = vmatprep.subr.bf16.mxu0 %v890_v41  ;;  %v922_v35 = vpack.c.bf16 %v441_v33, %v439_v32  ;;  %v440_v37 = vld [vmem:[#allocation8 + $0x1b0] sm:$0xff]  ;;  %v443_v38 = vld [vmem:[#allocation8 + $0x1c8] sm:$0xff]  ;;  %v445_v39 = vld [vmem:[#allocation8 + $0x1d8] sm:$0xff] }
  0xba   : > { %v924_v40 = vpack.c.bf16 %v440_v37, %v438_v36  ;;  %v926_v41 = vpack.c.bf16 %v445_v39, %v443_v38  ;;  %v442_v42 = vld [vmem:[#allocation8 + $0x1c0] sm:$0xff]  ;;  %v444_v43 = vld [vmem:[#allocation8 + $0x1d0] sm:$0xff]  ;;  %v447_v44 = vld [vmem:[#allocation8 + $0x1e8] sm:$0xff] }
  0xbb   : > { %v449_v45 = vld [vmem:[#allocation8 + $0x1f8] sm:$0xff]  ;;  %v928_v46 = vpack.c.bf16 %v444_v43, %v442_v42  ;;  %v446_v48 = vld [vmem:[#allocation8 + $0x1e0] sm:$0xff]  ;;  %v552_v62 = vld [vmem:[#allocation9 + $0x28] sm:$0xff] }
  0xbc   : > { %893 = vmatpush1.bf16.msra.mxu0 %v892_v49  ;;  %v930_v47 = vpack.c.bf16 %v449_v45, %v447_v44  ;;  %v448_v49 = vld [vmem:[#allocation8 + $0x1f0] sm:$0xff]  ;;  %v554_v1 = vld [vmem:[#allocation9 + $0x38] sm:$0xff]  ;;  %v555_v3 = vld [vmem:[#allocation9 + $0x40] sm:$0xff] }
  0xbd   : > { %895 = vmatprep.subr.bf16.mxu0 %v894_v52  ;;  %v932_v50 = vpack.c.bf16 %v448_v49, %v446_v48  ;;  %v553_v0 = vld [vmem:[#allocation9 + $0x30] sm:$0xff]  ;;  %v558_v7 = vld [vmem:[#allocation9 + $0x58] sm:$0xff]  ;;  %v559_v8 = vld [vmem:[#allocation9 + $0x60] sm:$0xff] }
  0xbe   : > { %v946_v2 = vpack.c.bf16 %v554_v1, %v553_v0  ;;  %v557_v6 = vld [vmem:[#allocation9 + $0x50] sm:$0xff]  ;;  %v562_v13 = vld [vmem:[#allocation9 + $0x78] sm:$0xff] }
  0xbf   : > { %v954_v9 = vpack.c.bf16 %v558_v7, %v557_v6  ;;  %v561_v12 = vld [vmem:[#allocation9 + $0x70] sm:$0xff] }
  0xc0   : > { %897 = vmatpush1.bf16.msra.mxu0 %v896_v61  ;;  %v551_v61 = vld [vmem:[#allocation9 + $0x20] sm:$0xff]  ;;  %v962_v14 = vpack.c.bf16 %v562_v13, %v561_v12 }
  0xc1   : > { %899 = vmatprep.subr.bf16.mxu0 %v898_v63  ;;  %v942_v63 = vpack.c.bf16 %v552_v62, %v551_v61 }
  0xc3   : > { %943 = vmatprep.subr.bf16.mxu1 %v942_v63 }
  0xc4   : > { %901 = vmatpush1.bf16.msra.mxu0 %v900_v4  ;;  %945 = vmatpush3.bf16.msra.mxu1 %v942_v63  ;;  %v556_v4 = vld [vmem:[#allocation9 + $0x48] sm:$0xff] }
  0xc5   : > { %903 = vmatprep.subr.bf16.mxu0 %v902_v5  ;;  %947 = vmatprep.subr.bf16.mxu1 %v946_v2  ;;  %v950_v5 = vpack.c.bf16 %v556_v4, %v555_v3 }
  0xc8   : > { %905 = vmatpush1.bf16.msra.mxu0 %v904_v10  ;;  %949 = vmatpush3.bf16.msra.mxu1 %v946_v2  ;;  %v560_v10 = vld [vmem:[#allocation9 + $0x68] sm:$0xff] }
  0xc9   : > { %907 = vmatprep.subr.bf16.mxu0 %v906_v11  ;;  %951 = vmatprep.subr.bf16.mxu1 %v950_v5  ;;  %v958_v11 = vpack.c.bf16 %v560_v10, %v559_v8 }
  0xcc   : > { %909 = vmatpush1.bf16.msra.mxu0 %v908_v16  ;;  %953 = vmatpush3.bf16.msra.mxu1 %v950_v5 }
  0xcd   : > { %911 = vmatprep.subr.bf16.mxu0 %v910_v17  ;;  %955 = vmatprep.subr.bf16.mxu1 %v954_v9 }
  0xd0   : > { %913 = vmatpush1.bf16.msra.mxu0 %v912_v22  ;;  %957 = vmatpush3.bf16.msra.mxu1 %v954_v9 }
  0xd1   : > { %915 = vmatprep.subr.bf16.mxu0 %v914_v23  ;;  %959 = vmatprep.subr.bf16.mxu1 %v958_v11 }
  0xd4   : > { %917 = vmatpush1.bf16.msra.mxu0 %v916_v28  ;;  %961 = vmatpush3.bf16.msra.mxu1 %v958_v11 }
  0xd5   : > { %919 = vmatprep.subr.bf16.mxu0 %v918_v29  ;;  %963 = vmatprep.subr.bf16.mxu1 %v962_v14 }
  0xd8   : > { %921 = vmatpush1.bf16.msra.mxu0 %v920_v34  ;;  %965 = vmatpush3.bf16.msra.mxu1 %v962_v14 }
  0xd9   : > { %923 = vmatprep.subr.bf16.mxu0 %v922_v35 }
  0xdc   : > { %925 = vmatpush1.bf16.msra.mxu0 %v924_v40 }
  0xdd   : > { %927 = vmatprep.subr.bf16.mxu0 %v926_v41 }
  0xe0   : > { %929 = vmatpush1.bf16.msra.mxu0 %v928_v46 }
  0xe1   : > { %931 = vmatprep.subr.bf16.mxu0 %v930_v47 }
  0xe4   : > { %933 = vmatpush1.bf16.msra.mxu0 %v932_v50 }
 0x114   : > { %v368_v51 = vpop.permute.xlu1 %367  ;;  %v366_v52 = vpop.permute.xlu0 %365 }
 0x115   : > { %373 = vst.msk [vmem:[#allocation2 + $0x18] sm:$0x1f] %vm372_vm3, %v368_v51 }
 0x116   : > { %371 = vst.msk [vmem:[#allocation2 + $0x8] sm:$0xff] %vm339_vm4, %v366_v52 }
 0x118   : > { %v378_v53 = vpop.permute.xlu1 %377  ;;  %v334_v54 = vpop.permute.xlu0 %333 }
 0x119   : > { %381 = vst.msk [vmem:[#allocation2 + $0x18] sm:$0xe0] %vm380_vm5, %v378_v53 }
 0x11a   : > { %340 = vst.msk [vmem:[#allocation2] sm:$0xff] %vm339_vm4, %v334_v54 }
 0x11c   : > { %v346_v55 = vpop.permute.xlu1 %345  ;;  %v336_v56 = vpop.permute.xlu0 %335 }
 0x11d   : > { %v383_v57 = vld [vmem:[#allocation2 + $0x8] sm:$0xff]  ;;  %349 = vst.msk [vmem:[#allocation2 + $0x17] sm:$0x1] %vm348_vm6, %v346_v55 }
 0x11e   : > { %342 = vst.msk [vmem:[#allocation2 + $0x10] sm:$0x7f] %vm341_vm7, %v336_v56  ;;  %514 = vmatprep.mubr.f32.mxu0 %v383_v57 }
 0x120   : > { %v385_v59 = vld [vmem:[#allocation2 + $0x18] sm:$0xff] }
 0x121   : > { %v382_v58 = vld [vmem:[#allocation2] sm:$0xff] }
 0x122   : > { %515 = vmatmul.mubr.f32.vlgmr.msra.gmra.mrb[0].mxu0 %v382_v58 }
 0x123   : > { %520 = vmatprep.mubr.f32.mxu0 %v385_v59 }
 0x125   : > { %v384_v60 = vld [vmem:[#allocation2 + $0x10] sm:$0xff] }
 0x126   : > { %521 = vmatmul.mubr.f32.gmra.mrb[2].mxu0 %v384_v60 }
 0x1f5   : > { %v516_v15 = vpop.f32.mrb[0].mxu0 }
 0x1f6   : > { %v527_v16 = vmul.f32 %v516_v15, %v516_v15  ;;  %v518_v17 = vpop.f32.mrb[1].mxu0 }
 0x1f7   : > { %v529_v18 = vmul.f32 %v518_v17, %v518_v17 }
 0x1f9   : > { %v531_v19 = vadd.f32 %v529_v18, %v527_v16  ;;  %v522_v20 = vpop.f32.mrb[2].mxu0 }
 0x1fa   : > { %v528_v21 = vmul.f32 %v522_v20, %v522_v20  ;;  %v524_v22 = vpop.f32.mrb[3].mxu0 }
 0x1fb   : > { %v530_v23 = vmul.f32 %v524_v22, %v524_v22  ;;  %1062 = vrsqrt.f32 %v531_v19  ;;  %vm535_vm8 = vcmp.eq.f32.partialorder %v531_v19, inf  ;;  %v538_v27 = vand.u32 2147483648, %v531_v19 }
 0x1fc   : > { %vm537_vm9 = vcmp.eq.f32.partialorder %v531_v19, 0.0 }
 0x1fd   : > { %v532_v24 = vadd.f32 %v530_v23, %v528_v21 }
 0x1ff   : > { %1064 = vrsqrt.f32 %v532_v24  ;;  %vm542_vm10 = vcmp.eq.f32.partialorder %v532_v24, inf  ;;  %v545_v32 = vand.u32 2147483648, %v532_v24  ;;  %vm544_vm11 = vcmp.eq.f32.partialorder %v532_v24, 0.0 }
 0x205   : > { %v1063_v25 = vpop.eup %1062 }
 0x206   : > { %v534_v26 = vmul.f32 %v1063_v25, %v531_v19 }
 0x208   : > { %v536_v28 = vsel %vm535_vm8, %v531_v19, %v534_v26 }
 0x209   : > { %v1065_v29 = vpop.eup %1064  ;;  %v539_v30 = vsel %vm537_vm9, %v538_v27, %v536_v28 }
 0x20a   : > { %867 = vmatprep.mubr.f32.mxu1 %v539_v30  ;;  %v541_v31 = vmul.f32 %v1065_v29, %v532_v24 }
 0x20c   : > { %v543_v33 = vsel %vm542_vm10, %v532_v24, %v541_v31 }
 0x20d   : > { %v546_v34 = vsel %vm544_vm11, %v545_v32, %v543_v33 }
 0x20e   : > { %868 = vmatmul.mubr.f32.vlgmr.msra.gmra.mrb[0].mxu1 %v546_v34 }
 0x2e1   : > { %v869_v35 = vpop.f32.mrb[0].mxu1 }
 0x2e2   : > { %v639_v36 = vmax.f32 %v869_v35, 1e-05  ;;  %v629_v37 = vpop.f32.mrb[1].mxu1 }
 0x2e3   : > { %v638_v38 = vmax.f32 %v629_v37, 1e-05 }
 0x2e4   : > { %1066 = vlog2.f32 %v639_v36 }
 0x2e5   : > { %1068 = vlog2.f32 %v638_v38 }
 0x2ee   : > { %v1067_v39 = vpop.eup %1066 }
 0x2ef   : > { %v1069_v40 = vpop.eup %1068  ;;  %v643_v41 = vmul.f32 0.6931472, %v1067_v39 }
 0x2f0   : > { %v641_v42 = vmul.f32 0.6931472, %v1069_v40 }
 0x2f1   : > { %645 = vst [vmem:[%s315_s21 + $0x8] sm:$0xff] %v643_v41 }
 0x2f2   : > { %644 = vst [vmem:[%s315_s21] sm:$0xff] %v641_v42 }
 0x2f3   : > { %1200 = shalt.err (!%p1197_p7)
}
 0x2f4   : > { %s1201_s6 = scalar_lea.hbm %s1594_s10, 256  ;;  %s1205_s26 = scalar_lea.hbm %s1647_s4, 512 }
 0x2f5   : > { %p1202_p13 = scmp.ne.s32.totalorder %s1594_s10, %s1201_s6  ;;  %p1206_p2 = scmp.lt.u32.totalorder %s1594_s10, %s1647_s4 }
 0x2f6   : > { %p1207_p11 = scmp.lt.u32.totalorder %s1205_s26, %s1201_s6  ;;  %p1209_p1 = scmp.lt.u32.totalorder %s1201_s6, %s1594_s10 }
 0x2f7   : > { %p1203_p8 = pnand %p1202_p13, %p1679_p6 }
 0x2f8   : > { %p1208_p0 = por %p1207_p11, %p1206_p2 }
 0x2f9   : > { %p1204_p12 = pneg %p1203_p8 }
 0x2fa   : > { %p1210_p10 = por %p1209_p1, %p1208_p0 }
 0x2fc   : > { %p1211_p3 = pnand %p1210_p10, %p1204_p12 }
 0x2fe   : > { %1214 = shalt.err (!%p1211_p3)
}
 0x2ff   : > { %s1293_s25 = smov 128   ;;  %s1294_s22 = smov 8  }
 0x300   : > { %979 = dma.vmem_to_hbm [thread:$0]  (%p1679_p6), %s1589_s9, 256, %s1594_s10, %s647_s13, %s1293_s25, %s1293_s25, %s1294_s22  }
 0x301 PF: > { %s677_s14 = sand.u32 1, %s1261_s15   ;;  %p1680_p4 = scmp.ne.s32.totalorder %s1659_s24, 0 }
 0x302   : > { %p1681_p9 = scmp.ge.s32.totalorder %s1281_s20, 2  ;;  %s678_s23 = scalar_lea.sflag [#allocation5], %s677_s14 }
 0x304   : > { %p996_p5 = pnand %p1681_p9, %p1680_p4 }
 0x306   : > { %1256 = dma.done.wait (!%p996_p5), %s678_s23, 256  }
 0x307   : > { %1258 = vsyncadd (!%p996_p5), %s678_s23, 4294967040  ;;  %s24_s20 = sadd.s32 1, %s1281_s20   ;;  %s1682_s21 = sld [smem:[#allocation18_spill]] }
 0x308   : > { %p21_p7 = scmp.ge.s32.totalorder %s24_s20, 4   ;;  %s1683_s28 = sld [smem:[#allocation17_spill]] }
 0x309   : > { %s1684_s15 = smov %s1265_s16  ;;  %s1685_s16 = smov %s1269_s17 }
 0x30a   : > { %s1687_s18 = smov %s1277_s19  ;;  %23 = sbr.rel (!%p21_p7) target bundleno = 13 (0xd), region = 102 }
 0x30d   : > { %s1686_s17 = smov %s1682_s21 }
 0x30e   : > { %s1688_s19 = smov %s1683_s28 }
 0x311   :  { %683 = vsyncpa [#allocation4], 1 }
 0x312   :  { %685 = vsyncpa [#allocation4 + $0x1], 1 }
 0x313   :  { %686 = vsyncpa [#allocation7], 1 }
 0x314   :  { %688 = vsyncpa [#allocation7 + $0x1], 1 }
 0x315   :  { %689 = vsyncpa [#allocation10], 1 }
 0x316   :  { %690 = vsyncpa [#allocation5], 1 }
 0x317   :  { %692 = vsyncpa [#allocation5 + $0x1], 1 }

</bundles_post_ra>
